<compile_context>
chip_gen: v7x
topology: tpu7x:2x2x1
jax: 0.10.0
libtpu: 0.0.40
codegen_flags: <defaults>
</compile_context>

<pallas_src>
import functools
import math

import jax
import jax.numpy as jnp
from jax.experimental import pallas as pl
from jax.experimental.pallas import tpu as pltpu


def _round_up(v: int, m: int) -> int:
    return ((v + m - 1) // m) * m


# ---------------------------------------------------------------------------
# Host-side constant construction (interp matrix, folded layer operators)
# ---------------------------------------------------------------------------
def _make_interp_matrix(l_in: int, l_out: int) -> jnp.ndarray:
    """M such that x @ M == F.interpolate(x, size=l_out, mode='linear',
    align_corners=False) applied along the last axis."""
    scale = l_in / l_out
    j = jnp.arange(l_out, dtype=jnp.float32)
    src = (j + 0.5) * scale - 0.5
    src = jnp.clip(src, 0.0, float(l_in - 1))
    i0 = jnp.floor(src).astype(jnp.int32)
    i1 = jnp.minimum(i0 + 1, l_in - 1)
    w1 = src - i0.astype(jnp.float32)
    w0 = 1.0 - w1
    jj = jnp.arange(l_out, dtype=jnp.int32)
    m = jnp.zeros((l_in, l_out), jnp.float32)
    m = m.at[i0, jj].add(w0)
    m = m.at[i1, jj].add(w1)
    return m


def _pad_matrix_cols(m: jnp.ndarray, pad_left: int, pad_right: int) -> jnp.ndarray:
    """Fold zero-padding of the length axis into the interpolation matrix."""
    return jnp.pad(m, ((0, 0), (pad_left, pad_right)))


def _conv_init(key, c_out: int, c_in: int, k: int):
    """Deterministic Conv1d-style init (uniform +- 1/sqrt(fan_in))."""
    kw, kb = jax.random.split(key)
    bound = 1.0 / math.sqrt(c_in * k)
    w = jax.random.uniform(kw, (c_out, c_in, k), jnp.float32, -bound, bound)
    b = jax.random.uniform(kb, (c_out,), jnp.float32, -bound, bound)
    return w, b


def _fold_layer(w, b, scale, shift, m_pad, l_out):
    """Fold interp+pad (m_pad), Conv1d (w, b) and BN-eval affine (scale, shift)
    into one operator T (C_in*L_in, C_out*L_out) and one shift row s so that
        layer(x) == maybe_relu(x_flat @ T + s)."""
    c_out, c_in, k = w.shape
    l_in = m_pad.shape[0]
    t = jnp.zeros((c_in, l_in, c_out, l_out), jnp.float32)
    for kk in range(k):
        # outer product (no contraction) -> precision-exact construction
        t = t + jnp.einsum('oi,lt->ilot', w[:, :, kk], m_pad[:, kk:kk + l_out])
    t = t * scale[None, None, :, None]                      # fold BN scale
    t = t.reshape(c_in * l_in, c_out * l_out)
    s = b * scale + shift                                   # fold conv bias into shift
    s = jnp.broadcast_to(s[:, None], (c_out, l_out)).reshape(1, c_out * l_out)
    return t, s


# ---------------------------------------------------------------------------
# Fused Pallas kernel: whole head = chain of (matmul + shift [+ ReLU])
# ---------------------------------------------------------------------------
def _head_kernel(*refs, num_layers):
    x_ref = refs[0]
    t_refs = refs[1:1 + num_layers]
    s_refs = refs[1 + num_layers:1 + 2 * num_layers]
    o_ref = refs[1 + 2 * num_layers]

    h = x_ref[...]                                          # (NB, P0), bf16
    acc = None
    for i in range(num_layers):                             # static unroll (depth+1)
        acc = jnp.dot(h, t_refs[i][...],
                      preferred_element_type=jnp.float32)   # MXU, f32 accumulate
        acc = acc + s_refs[i][...]                          # folded bias/BN shift (f32)
        if i + 1 < num_layers:
            acc = jnp.maximum(acc, 0.0)                     # ReLU (all but out_conv)
            h = acc.astype(jnp.bfloat16)                    # feed next MXU matmul in bf16
    o_ref[...] = acc                                        # f32, lane-dense (P % 128 == 0)


_BATCH_MAP = lambda i: (i, 0)
_CONST_MAP = lambda i: (0, 0)


@functools.partial(jax.jit, static_argnames=("out_channels", "l_final", "nb_max"))
def head_forward_pallas(x, ts_p, ss_p, *, out_channels, l_final, nb_max=128):
    """Run the whole head in one pallas_call.

    ts_p: list of bf16 operators, each zero-padded so both dims are multiples
          of 128.  ss_p: matching f32 shift rows (1, P)."""
    n, c0, l0 = x.shape
    num_layers = len(ts_p)
    pdims = [ts_p[0].shape[0]] + [t.shape[1] for t in ts_p]

    # Batch rows go on the sublane axis; pad to a multiple of 16 (bf16 packing).
    n_pad = _round_up(n, 16)
    if n_pad <= nb_max:
        nb = n_pad
    else:
        nb = nb_max
        n_pad = _round_up(n_pad, nb)

    x_flat = x.reshape(n, c0 * l0)
    x_flat = jnp.pad(x_flat, ((0, n_pad - n), (0, pdims[0] - c0 * l0)))
    x_flat = x_flat.astype(jnp.bfloat16)

    in_specs = [pl.BlockSpec((nb, pdims[0]), _BATCH_MAP)]
    for i in range(num_layers):                             # grid-invariant operators
        in_specs.append(pl.BlockSpec((pdims[i], pdims[i + 1]), _CONST_MAP))
    for i in range(num_layers):                             # grid-invariant shifts
        in_specs.append(pl.BlockSpec((1, pdims[i + 1]), _CONST_MAP))

    kernel = functools.partial(_head_kernel, num_layers=num_layers)
    out = pl.pallas_call(
        kernel,
        out_shape=jax.ShapeDtypeStruct((n_pad, pdims[-1]), jnp.float32),
        grid_spec=pltpu.PrefetchScalarGridSpec(
            num_scalar_prefetch=0,
            grid=(n_pad // nb,),
            in_specs=in_specs,
            out_specs=pl.BlockSpec((nb, pdims[-1]), _BATCH_MAP),
        ),
        compiler_params=pltpu.CompilerParams(dimension_semantics=("parallel",)),
    )(x_flat, *ts_p, *ss_p)

    return out[:n, :out_channels * l_final].reshape(n, out_channels, l_final)


# ---------------------------------------------------------------------------
# Pure-JAX references (for self-checks)
# ---------------------------------------------------------------------------
def _folded_reference(x, ts, ss, out_channels, l_final, compute_dtype):
    """Mirror of the fused kernel math (same folded operators / dtypes)."""
    n = x.shape[0]
    h = x.reshape(n, -1).astype(compute_dtype)
    num = len(ts)
    acc = None
    for i in range(num):
        acc = jnp.dot(h, ts[i].astype(compute_dtype),
                      preferred_element_type=jnp.float32,
                      precision=jax.lax.Precision.HIGHEST)
        acc = acc + ss[i]
        if i + 1 < num:
            acc = jnp.maximum(acc, 0.0)
            h = acc.astype(compute_dtype)
    return acc.reshape(n, out_channels, l_final)


def _direct_layer_f32(x, m_pad, w, b, scale, shift, relu):
    """Unfused f32 reference: interp+pad (matmul) -> conv taps -> affine -> relu."""
    xi = jnp.einsum('ncl,lp->ncp', x, m_pad, precision=jax.lax.Precision.HIGHEST)
    c_out, _, k = w.shape
    l_out = m_pad.shape[1] - k + 1
    acc = jnp.zeros((x.shape[0], c_out, l_out), jnp.float32)
    for kk in range(k):
        acc = acc + jnp.einsum('oi,nip->nop', w[:, :, kk], xi[:, :, kk:kk + l_out],
                               precision=jax.lax.Precision.HIGHEST)
    acc = acc + b[None, :, None]
    acc = acc * scale[None, :, None] + shift[None, :, None]
    if relu:
        acc = jnp.maximum(acc, 0.0)
    return acc


# ---------------------------------------------------------------------------
# Module wrapper (mirrors HeadDetectionPicking)
# ---------------------------------------------------------------------------
class HeadDetectionPickingPallas:
    """act_layer=ReLU, norm_layer=BatchNorm1d(eval), out_act_layer=Identity."""

    def __init__(self, feature_channels, layer_channels, layer_kernel_sizes,
                 out_channels=1, key=None):
        assert len(layer_channels) == len(layer_kernel_sizes)
        self.depth = len(layer_channels)
        self.out_channels = out_channels
        self.kernel_sizes = list(layer_kernel_sizes)
        if key is None:
            key = jax.random.PRNGKey(0)

        ins = [feature_channels] + list(layer_channels[:-1])
        outs = list(layer_channels[:-1]) + [out_channels * 2]
        eps = 1e-5
        self.weights, self.biases, self.scales, self.shifts = [], [], [], []
        for inc, outc, kers in zip(ins, outs, layer_kernel_sizes):
            key, kconv, kbn = jax.random.split(key, 3)
            w, b = _conv_init(kconv, outc, inc, kers)
            g1, g2, g3, g4 = jax.random.split(kbn, 4)
            gamma = 1.0 + 0.1 * jax.random.normal(g1, (outc,), jnp.float32)
            beta = 0.05 * jax.random.normal(g2, (outc,), jnp.float32)
            rmean = 0.1 * jax.random.normal(g3, (outc,), jnp.float32)
            rvar = 1.0 + 0.2 * jnp.abs(jax.random.normal(g4, (outc,), jnp.float32))
            scale = gamma / jnp.sqrt(rvar + eps)
            shift = beta - rmean * scale
            self.weights.append(w)
            self.biases.append(b)
            self.scales.append(scale)
            self.shifts.append(shift)

        key, kout = jax.random.split(key)
        self.out_w, self.out_b = _conv_init(kout, out_channels, out_channels * 2, 7)

        self._raw_cache = {}   # (l_in, l_target) -> (ts f32, ss f32, l_final)
        self._pad_cache = {}   # (l_in, l_target) -> (ts bf16 padded, ss f32 padded, l_final)

    def _upsampling_sizes(self, in_size: int, out_size: int):
        sizes = [out_size] * self.depth
        factor = (out_size / in_size) ** (1 / self.depth)
        for i in range(self.depth - 2, -1, -1):
            sizes[i] = int(sizes[i + 1] / factor)
        return sizes

    def _folded_params_raw(self, l_in: int, l_target: int):
        """Folded (T, s) in f32, unpadded, for every up_layer plus the out_conv."""
        cache_key = (int(l_in), int(l_target))
        if cache_key in self._raw_cache:
            return self._raw_cache[cache_key]
        up_sizes = self._upsampling_sizes(l_in, l_target)
        ts, ss = [], []
        l = l_in
        for i in range(self.depth):
            k = self.kernel_sizes[i]
            up = up_sizes[i]
            m = _make_interp_matrix(l, up)
            pds = k - 1                                      # _auto_pad_1d, stride=1
            m_pad = _pad_matrix_cols(m, pds // 2, pds - pds // 2)
            t, s = _fold_layer(self.weights[i], self.biases[i],
                               self.scales[i], self.shifts[i], m_pad, up)
            ts.append(t)
            ss.append(s)
            l = up
        # out_conv: Conv1d(out_channels*2 -> out_channels, k=7, padding=3), no affine/act
        m_pad = _pad_matrix_cols(jnp.eye(l, dtype=jnp.float32), 3, 3)
        ones = jnp.ones((self.out_channels,), jnp.float32)
        zeros = jnp.zeros((self.out_channels,), jnp.float32)
        t, s = _fold_layer(self.out_w, self.out_b, ones, zeros, m_pad, l)
        ts.append(t)
        ss.append(s)
        result = (ts, ss, l)
        self._raw_cache[cache_key] = result
        return result

    def _folded_params_padded(self, l_in: int, l_target: int):
        """Padded (multiple-of-128) bf16 operators + f32 shifts; cached."""
        cache_key = (int(l_in), int(l_target))
        if cache_key in self._pad_cache:
            return self._pad_cache[cache_key]
        ts, ss, l_final = self._folded_params_raw(l_in, l_target)
        dims = [ts[0].shape[0]] + [t.shape[1] for t in ts]
        pdims = [_round_up(d, 128) for d in dims]
        ts_p, ss_p = [], []
        for i in range(len(ts)):
            t = jnp.pad(ts[i], ((0, pdims[i] - dims[i]), (0, pdims[i + 1] - dims[i + 1])))
            s = jnp.pad(ss[i], ((0, 0), (0, pdims[i + 1] - dims[i + 1])))
            ts_p.append(jax.device_put(t.astype(jnp.bfloat16)))
            ss_p.append(jax.device_put(s.astype(jnp.float32)))
        result = (ts_p, ss_p, l_final)
        self._pad_cache[cache_key] = result
        return result

    def __call__(self, x, x0):
        ts_p, ss_p, l_final = self._folded_params_padded(x.shape[-1], x0.shape[-1])
        return head_forward_pallas(x, ts_p, ss_p,
                                   out_channels=self.out_channels, l_final=l_final)

    def reference_folded(self, x, x0, compute_dtype=jnp.float32):
        ts, ss, l_final = self._folded_params_raw(x.shape[-1], x0.shape[-1])
        return _folded_reference(x, ts, ss, self.out_channels, l_final, compute_dtype)

    def reference_direct(self, x, x0):
        up_sizes = self._upsampling_sizes(x.shape[-1], x0.shape[-1])
        for i in range(self.depth):
            k = self.kernel_sizes[i]
            m = _make_interp_matrix(x.shape[-1], up_sizes[i])
            pds = k - 1
            m_pad = _pad_matrix_cols(m, pds // 2, pds - pds // 2)
            x = _direct_layer_f32(x, m_pad, self.weights[i], self.biases[i],
                                  self.scales[i], self.shifts[i], True)
        m_pad = _pad_matrix_cols(jnp.eye(x.shape[-1], dtype=jnp.float32), 3, 3)
        ones = jnp.ones((self.out_channels,), jnp.float32)
        zeros = jnp.zeros((self.out_channels,), jnp.float32)
        x = _direct_layer_f32(x, m_pad, self.out_w, self.out_b, ones, zeros, False)
        return x  # out_act = Identity


# ---------------------------------------------------------------------------
if __name__ == "__main__":
    feature_channels = 8
    layer_channels = [8, 8]
    layer_kernel_sizes = [3, 3]
    out_channels = 1
    N, L_in, L0 = 2, 16, 64

    head = HeadDetectionPickingPallas(feature_channels, layer_channels,
                                      layer_kernel_sizes, out_channels=out_channels,
                                      key=jax.random.PRNGKey(0))

    kx, k0 = jax.random.split(jax.random.PRNGKey(0))
    x = jax.random.normal(kx, (N, feature_channels, L_in), jnp.float32)
    x0 = jax.random.normal(k0, (N, 3, L0), jnp.float32)   # only x0.shape[-1] is used

    out = head(x, x0)
    out = jax.block_until_ready(out)
    assert out.shape == (N, out_channels, L0), out.shape

    # Check 1: folded-operator algebra (f32) matches direct per-layer math (f32).
    ref_direct = head.reference_direct(x, x0)
    ref_folded_f32 = head.reference_folded(x, x0, jnp.float32)
    assert jnp.allclose(ref_folded_f32, ref_direct, atol=1e-3, rtol=1e-3), \
        "folded operator mismatch vs direct f32 reference"

    # Check 2: Pallas lowering matches dtype-matched JAX reference (bf16 ops, f32 accum).
    ref_folded_bf16 = head.reference_folded(x, x0, jnp.bfloat16)
    assert jnp.allclose(out, ref_folded_bf16, atol=2e-3, rtol=2e-3), \
        "pallas kernel mismatch vs dtype-matched JAX reference"

    print("KERNEL_OK")
</pallas_src>

<mosaic_0001>
module attributes {stable_mosaic.version = 11 : i64} {
  func.func @_head_kernel(%arg0: i32, %arg1: memref<16x128xbf16, #tpu.memory_space<vmem>>, %arg2: memref<128x256xbf16, #tpu.memory_space<vmem>>, %arg3: memref<256x128xbf16, #tpu.memory_space<vmem>>, %arg4: memref<128x128xbf16, #tpu.memory_space<vmem>>, %arg5: memref<1x256xf32, #tpu.memory_space<vmem>>, %arg6: memref<1x128xf32, #tpu.memory_space<vmem>>, %arg7: memref<1x128xf32, #tpu.memory_space<vmem>>, %arg8: memref<16x128xf32, #tpu.memory_space<vmem>>) attributes {dimension_semantics = [#tpu.dimension_semantics<parallel>], iteration_bounds = array<i64: 1>, scalar_prefetch = 0 : i64, scratch_operands = 0 : i64, tpu.core_type = #tpu.core_type<tc>, window_params = [{transform_indices = @transform_0, window_bounds = array<i64: 16, 128>}, {pipeline_mode = #tpu.pipeline_mode<synchronous>, transform_indices = @transform_1, window_bounds = array<i64: 128, 256>}, {pipeline_mode = #tpu.pipeline_mode<synchronous>, transform_indices = @transform_2, window_bounds = array<i64: 256, 128>}, {pipeline_mode = #tpu.pipeline_mode<synchronous>, transform_indices = @transform_3, window_bounds = array<i64: 128, 128>}, {pipeline_mode = #tpu.pipeline_mode<synchronous>, transform_indices = @transform_4, window_bounds = array<i64: 1, 256>}, {pipeline_mode = #tpu.pipeline_mode<synchronous>, transform_indices = @transform_5, window_bounds = array<i64: 1, 128>}, {pipeline_mode = #tpu.pipeline_mode<synchronous>, transform_indices = @transform_6, window_bounds = array<i64: 1, 128>}, {transform_indices = @transform_7, window_bounds = array<i64: 16, 128>}]} {
    %c0 = arith.constant 0 : index
    %c0_0 = arith.constant 0 : index
    %0 = vector.load %arg1[%c0, %c0_0] : memref<16x128xbf16, #tpu.memory_space<vmem>>, vector<16x128xbf16>
    %c0_1 = arith.constant 0 : index
    %c0_2 = arith.constant 0 : index
    %1 = vector.load %arg2[%c0_1, %c0_2] : memref<128x256xbf16, #tpu.memory_space<vmem>>, vector<128x256xbf16>
    %cst = arith.constant dense<0.000000e+00> : vector<16x256xf32>
    %2 = tpu.matmul %0, %1, %cst {dimension_numbers = #tpu.dot_dimension_numbers<[1], [0], [0], [1], [0, 0, 1, 1], [], []>} : vector<16x128xbf16>, vector<128x256xbf16>, vector<16x256xf32> -> vector<16x256xf32>
    %c0_3 = arith.constant 0 : index
    %c0_4 = arith.constant 0 : index
    %3 = vector.load %arg5[%c0_3, %c0_4] : memref<1x256xf32, #tpu.memory_space<vmem>>, vector<1x256xf32>
    %4 = vector.broadcast %3 : vector<1x256xf32> to vector<16x256xf32>
    %5 = arith.addf %2, %4 : vector<16x256xf32>
    %cst_5 = arith.constant 0.000000e+00 : f32
    %6 = vector.broadcast %cst_5 : f32 to vector<16x256xf32>
    %7 = arith.maximumf %5, %6 : vector<16x256xf32>
    %8 = arith.truncf %7 : vector<16x256xf32> to vector<16x256xbf16>
    %c0_6 = arith.constant 0 : index
    %c0_7 = arith.constant 0 : index
    %9 = vector.load %arg3[%c0_6, %c0_7] : memref<256x128xbf16, #tpu.memory_space<vmem>>, vector<256x128xbf16>
    %cst_8 = arith.constant dense<0.000000e+00> : vector<16x128xf32>
    %10 = tpu.matmul %8, %9, %cst_8 {dimension_numbers = #tpu.dot_dimension_numbers<[1], [0], [0], [1], [0, 0, 1, 1], [], []>} : vector<16x256xbf16>, vector<256x128xbf16>, vector<16x128xf32> -> vector<16x128xf32>
    %c0_9 = arith.constant 0 : index
    %c0_10 = arith.constant 0 : index
    %11 = vector.load %arg6[%c0_9, %c0_10] : memref<1x128xf32, #tpu.memory_space<vmem>>, vector<1x128xf32>
    %12 = vector.broadcast %11 : vector<1x128xf32> to vector<16x128xf32>
    %13 = arith.addf %10, %12 : vector<16x128xf32>
    %cst_11 = arith.constant 0.000000e+00 : f32
    %14 = vector.broadcast %cst_11 : f32 to vector<16x128xf32>
    %15 = arith.maximumf %13, %14 : vector<16x128xf32>
    %16 = arith.truncf %15 : vector<16x128xf32> to vector<16x128xbf16>
    %c0_12 = arith.constant 0 : index
    %c0_13 = arith.constant 0 : index
    %17 = vector.load %arg4[%c0_12, %c0_13] : memref<128x128xbf16, #tpu.memory_space<vmem>>, vector<128x128xbf16>
    %cst_14 = arith.constant dense<0.000000e+00> : vector<16x128xf32>
    %18 = tpu.matmul %16, %17, %cst_14 {dimension_numbers = #tpu.dot_dimension_numbers<[1], [0], [0], [1], [0, 0, 1, 1], [], []>} : vector<16x128xbf16>, vector<128x128xbf16>, vector<16x128xf32> -> vector<16x128xf32>
    %c0_15 = arith.constant 0 : index
    %c0_16 = arith.constant 0 : index
    %19 = vector.load %arg7[%c0_15, %c0_16] : memref<1x128xf32, #tpu.memory_space<vmem>>, vector<1x128xf32>
    %20 = vector.broadcast %19 : vector<1x128xf32> to vector<16x128xf32>
    %21 = arith.addf %18, %20 : vector<16x128xf32>
    %c0_17 = arith.constant 0 : index
    %c0_18 = arith.constant 0 : index
    %22 = vector.load %arg8[%c0_17, %c0_18] : memref<16x128xf32, #tpu.memory_space<vmem>>, vector<16x128xf32>
    tpu.vector_store %arg8[%c0_17, %c0_18], %21 {strides = array<i32>} : memref<16x128xf32, #tpu.memory_space<vmem>>, vector<16x128xf32>,
    return
  }
  func.func @transform_0(%arg0: i32) -> (i32, i32) {
    %c0_i32 = arith.constant 0 : i32
    %c0_i32_0 = arith.constant 0 : i32
    return %arg0, %c0_i32 : i32, i32
  }
  func.func @transform_1(%arg0: i32) -> (i32, i32) {
    %c0_i32 = arith.constant 0 : i32
    %c0_i32_0 = arith.constant 0 : i32
    %c0_i32_1 = arith.constant 0 : i32
    return %c0_i32, %c0_i32_0 : i32, i32
  }
  func.func @transform_2(%arg0: i32) -> (i32, i32) {
    %c0_i32 = arith.constant 0 : i32
    %c0_i32_0 = arith.constant 0 : i32
    %c0_i32_1 = arith.constant 0 : i32
    return %c0_i32, %c0_i32_0 : i32, i32
  }
  func.func @transform_3(%arg0: i32) -> (i32, i32) {
    %c0_i32 = arith.constant 0 : i32
    %c0_i32_0 = arith.constant 0 : i32
    %c0_i32_1 = arith.constant 0 : i32
    return %c0_i32, %c0_i32_0 : i32, i32
  }
  func.func @transform_4(%arg0: i32) -> (i32, i32) {
    %c0_i32 = arith.constant 0 : i32
    %c0_i32_0 = arith.constant 0 : i32
    %c0_i32_1 = arith.constant 0 : i32
    return %c0_i32, %c0_i32_0 : i32, i32
  }
  func.func @transform_5(%arg0: i32) -> (i32, i32) {
    %c0_i32 = arith.constant 0 : i32
    %c0_i32_0 = arith.constant 0 : i32
    %c0_i32_1 = arith.constant 0 : i32
    return %c0_i32, %c0_i32_0 : i32, i32
  }
  func.func @transform_6(%arg0: i32) -> (i32, i32) {
    %c0_i32 = arith.constant 0 : i32
    %c0_i32_0 = arith.constant 0 : i32
    %c0_i32_1 = arith.constant 0 : i32
    return %c0_i32, %c0_i32_0 : i32, i32
  }
  func.func @transform_7(%arg0: i32) -> (i32, i32) {
    %c0_i32 = arith.constant 0 : i32
    %c0_i32_0 = arith.constant 0 : i32
    return %arg0, %c0_i32 : i32, i32
  }
}

</mosaic_0001>

<bundles_post_ra>
// kernel: head_forward_pallas.1
= control target key start
LH: loop header
LB: loop body
LE: loop exit
PB: predicated region body
PF: predicated region fallthrough
CT: control target
= control target key end

     0   :  { %12 = vsyncpa [#allocation3], 0  ;;  %s865_s0 = inlined_call_operand.vmem [shape: bf16[16,128], index: 0, kind: input, shape index: {}]   ;;  %s866_s1 = inlined_call_operand.hbm [shape: bf16[128,256], index: 1, kind: input, shape index: {}]   ;;  %s867_s2 = inlined_call_operand.hbm [shape: bf16[256,128], index: 2, kind: input, shape index: {}]   ;;  %s868_s3 = inlined_call_operand.hbm [shape: bf16[128,128], index: 3, kind: input, shape index: {}]   ;;  %s869_s4 = inlined_call_operand.vmem [shape: f32[1,256], index: 4, kind: input, shape index: {}]   ;;  %s870_s5 = inlined_call_operand.vmem [shape: f32[1,128], index: 5, kind: input, shape index: {}]   ;;  %s871_s6 = inlined_call_operand.vmem [shape: f32[1,128], index: 6, kind: input, shape index: {}]   ;;  %s872_s7 = inlined_call_operand.vmem [shape: f32[16,128], index: 7, kind: output, shape index: {}]  }
   0x1   :  { %13 = vsyncpa [#allocation5], 0  ;;  %s755_s24 = smov [#allocation4]   ;;  %s685_s28 = scalar_lea.hbm %s867_s2, 2048 }
   0x2   :  { %s33_s25 = sshll.u32 %s755_s24, 4  ;;  %p686_p0 = scmp.ne.s32.totalorder %s867_s2, %s685_s28  ;;  %s34_s25 = int_to_ptr.vmem [resolvable:$true] %s33_s25 }
   0x3   :  { %p689_p1 = scmp.lt.u32.totalorder %s685_s28, %s867_s2 }
   0x5   :  { %p691_p2 = pnand %p689_p1, %p686_p0 }
   0x7   :  { %694 = shalt.err (!%p691_p2)
}
   0x8   :  { %s695_s10 = scalar_lea.vmem %s34_s25, 2048  ;;  %p700_p4 = scmp.lt.s32.totalorder %s34_s25, %s34_s25 }
   0x9   :  { %p696_p3 = scmp.ne.s32.totalorder %s34_s25, %s695_s10  ;;  %p701_p5 = scmp.lt.s32.totalorder %s695_s10, %s695_s10 }
   0xb   :  { %p702_p6 = por %p701_p5, %p700_p4 }
   0xd   :  { %p703_p7 = pnand %p702_p6, %p696_p3 }
   0xf   :  { %706 = shalt.err (!%p703_p7)
}
  0x10   :  { %s756_s11 = smov 64   ;;  %s757_s12 = smov 4  }
  0x11   :  { %39 = dma.hbm_to_vmem [thread:$0]  %s867_s2, 2048, %s34_s25, [#allocation5], %s756_s11, %s756_s11, %s757_s12  }
  0x12   :  { %s758_s15 = smov [#allocation2]   ;;  %s707_s19 = scalar_lea.hbm %s866_s1, 2048 }
  0x13   :  { %s21_s16 = sshll.u32 %s758_s15, 4  ;;  %p708_p8 = scmp.ne.s32.totalorder %s866_s1, %s707_s19  ;;  %s22_s16 = int_to_ptr.vmem [resolvable:$true] %s21_s16 }
  0x14   :  { %p711_p9 = scmp.lt.u32.totalorder %s707_s19, %s866_s1 }
  0x16   :  { %p713_p10 = pnand %p711_p9, %p708_p8 }
  0x18   :  { %716 = shalt.err (!%p713_p10)
}
  0x19   :  { %s717_s24 = scalar_lea.vmem %s22_s16, 2048  ;;  %p722_p12 = scmp.lt.s32.totalorder %s22_s16, %s22_s16 }
  0x1a   :  { %p718_p11 = scmp.ne.s32.totalorder %s22_s16, %s717_s24  ;;  %p723_p13 = scmp.lt.s32.totalorder %s717_s24, %s717_s24 }
  0x1c   :  { %p724_p0 = por %p723_p13, %p722_p12 }
  0x1e   :  { %p725_p1 = pnand %p724_p0, %p718_p11 }
  0x20   :  { %728 = shalt.err (!%p725_p1)
}
  0x21   :  { %s759_s2 = smov 128   ;;  %s760_s25 = smov 8  }
  0x22   :  { %27 = dma.hbm_to_vmem [thread:$0]  %s866_s1, 2048, %s22_s16, [#allocation3], %s759_s2, %s759_s2, %s760_s25  }
  0x23   :  { %s761_s28 = smov [#allocation6]   ;;  %s729_s9 = scalar_lea.hbm %s868_s3, 1024 }
  0x24   :  { %s45_s29 = sshll.u32 %s761_s28, 4  ;;  %p730_p2 = scmp.ne.s32.totalorder %s868_s3, %s729_s9  ;;  %s46_s29 = int_to_ptr.vmem [resolvable:$true] %s45_s29 }
  0x25   :  { %p733_p3 = scmp.lt.u32.totalorder %s729_s9, %s868_s3 }
  0x27   :  { %p735_p4 = pnand %p733_p3, %p730_p2 }
  0x29   :  { %738 = shalt.err (!%p735_p4)
}
  0x2a   :  { %s739_s17 = scalar_lea.vmem %s46_s29, 1024  ;;  %p744_p6 = scmp.lt.s32.totalorder %s46_s29, %s46_s29 }
  0x2b   :  { %p740_p5 = scmp.ne.s32.totalorder %s46_s29, %s739_s17  ;;  %p745_p7 = scmp.lt.s32.totalorder %s739_s17, %s739_s17 }
  0x2d   :  { %p746_p8 = por %p745_p7, %p744_p6 }
  0x2f   :  { %p747_p9 = pnand %p746_p8, %p740_p5 }
  0x31   :  { %750 = shalt.err (!%p747_p9)
}
  0x32   :  { %51 = dma.hbm_to_vmem [thread:$0]  %s868_s3, 1024, %s46_s29, [#allocation5], %s756_s11, %s756_s11, %s757_s12  }
  0x33   :  { %751 = dma.done.wait [#allocation3], 2048  }
  0x34   :  { %752 = vsyncadd [#allocation3], 4294965248 }
  0x35   :  { %753 = dma.done.wait [#allocation5], 3072  }
  0x36   :  { %754 = vsyncadd [#allocation5], 4294964224  ;;  %v762_v0 = vmov 0   ;;  %v636_v1 = vld [vmem:[#allocation2 + $0x4] ss:$8 sps:$4 sm:$0xff]   ;;  %v665_v16 = vld [vmem:[#allocation4 + $0x50] sm:$0xff]   ;;  %v88_v40 = vlaneseq }
  0x37   :  { %216 = vmatprep.mubr.bf16.mxu0 %v762_v0  ;;  %v638_v2 = vld [vmem:[#allocation2] ss:$8 sps:$4 sm:$0xff]   ;;  %184 = vmatprep.subr.bf16.mxu0 %v636_v1  ;;  %v639_v3 = vld [vmem:[#allocation2 + $0x14] ss:$8 sps:$4 sm:$0xff]   ;;  %v641_v4 = vld [vmem:[#allocation2 + $0x10] ss:$8 sps:$4 sm:$0xff]  }
  0x38   :  { %185 = vmatpush1.bf16.msra.mxu0 %v638_v2  ;;  %v642_v5 = vld [vmem:[#allocation2 + $0x24] ss:$8 sps:$4 sm:$0xff]   ;;  %v644_v6 = vld [vmem:[#allocation2 + $0x20] ss:$8 sps:$4 sm:$0xff]   ;;  %v645_v7 = vld [vmem:[#allocation2 + $0x34] ss:$8 sps:$4 sm:$0xff]  }
  0x39   :  { %186 = vmatprep.subr.bf16.mxu0 %v639_v3  ;;  %v647_v8 = vld [vmem:[#allocation2 + $0x30] ss:$8 sps:$4 sm:$0xff]   ;;  %v648_v9 = vld [vmem:[#allocation2 + $0x44] ss:$8 sps:$4 sm:$0xff]   ;;  %v650_v11 = vld [vmem:[#allocation2 + $0x40] ss:$8 sps:$4 sm:$0xff]  }
  0x3a   :  { %v661_v10 = vld [vmem:[#allocation4 + $0x40] sm:$0xff]   ;;  %v651_v13 = vld [vmem:[#allocation2 + $0x54] ss:$8 sps:$4 sm:$0xff]   ;;  %v663_v14 = vld [vmem:[#allocation4 + $0x48] sm:$0xff]   ;;  %v763_v35 = vmov 0.0   ;;  %v89_v41 = vshrl.u32 %v88_v40, 7 }
  0x3b   :  { %v662_v12 = vld [vmem:[#allocation4] sm:$0xff]   ;;  %575 = vmatprep.subr.bf16.mxu1 %v661_v10  ;;  %v664_v15 = vld [vmem:[#allocation4 + $0x8] sm:$0xff]   ;;  %v653_v17 = vld [vmem:[#allocation2 + $0x50] ss:$8 sps:$4 sm:$0xff]   ;;  %vm764_vm0 = vmmov 0  }
  0x3c   :  { %187 = vmatpush1.bf16.msra.mxu0 %v641_v4  ;;  %576 = vmatpush3.bf16.msra.mxu1 %v662_v12  ;;  %v654_v18 = vld [vmem:[#allocation2 + $0x64] ss:$8 sps:$4 sm:$0xff]   ;;  %v666_v19 = vld [vmem:[#allocation4 + $0x10] sm:$0xff]   ;;  %v667_v20 = vld [vmem:[#allocation4 + $0x58] sm:$0xff]   ;;  %v90_v42 = vsub.s32 0, %v89_v41  ;;  %v94_v44 = vsub.s32 1, %v89_v41 }
  0x3d   :  { %188 = vmatprep.subr.bf16.mxu0 %v642_v5  ;;  %577 = vmatprep.subr.bf16.mxu1 %v663_v14  ;;  %v656_v21 = vld [vmem:[#allocation2 + $0x60] ss:$8 sps:$4 sm:$0xff]   ;;  %v657_v22 = vld [vmem:[#allocation2 + $0x74] ss:$8 sps:$4 sm:$0xff]   ;;  %v659_v25 = vld [vmem:[#allocation2 + $0x70] ss:$8 sps:$4 sm:$0xff]  }
  0x3e   :  { %v668_v23 = vld [vmem:[#allocation4 + $0x18] sm:$0xff]   ;;  %v669_v24 = vld [vmem:[#allocation4 + $0x60] sm:$0xff]   ;;  %v671_v27 = vld [vmem:[#allocation4 + $0x68] sm:$0xff]  }
  0x3f   :  { %v670_v26 = vld [vmem:[#allocation4 + $0x20] sm:$0xff]   ;;  %v672_v29 = vld [vmem:[#allocation4 + $0x28] sm:$0xff]   ;;  %v673_v30 = vld [vmem:[#allocation4 + $0x70] sm:$0xff]  }
  0x40   :  { %189 = vmatpush1.bf16.msra.mxu0 %v644_v6  ;;  %578 = vmatpush3.bf16.msra.mxu1 %v664_v15  ;;  %v660_v28 = vld [vmem:[%s865_s0] sm:$0xff]   ;;  %v674_v31 = vld [vmem:[#allocation4 + $0x30] sm:$0xff]   ;;  %v675_v32 = vld [vmem:[#allocation4 + $0x78] sm:$0xff]  }
  0x41   :  { %190 = vmatprep.subr.bf16.mxu0 %v645_v7  ;;  %579 = vmatprep.subr.bf16.mxu1 %v665_v16  ;;  %v676_v33 = vld [vmem:[#allocation4 + $0x38] sm:$0xff]   ;;  %v677_v34 = vld [vmem:[#allocation6] sm:$0xff]   ;;  %v678_v36 = vld [vmem:[#allocation6 + $0x8] sm:$0xff]  }
  0x42   :  { %v679_v37 = vld [vmem:[#allocation6 + $0x10] sm:$0xff]   ;;  %v680_v38 = vld [vmem:[#allocation6 + $0x18] sm:$0xff]   ;;  %v681_v39 = vld [vmem:[#allocation6 + $0x20] sm:$0xff]  }
  0x43   :  { %v86_v43 = vld [vmem:[%s869_s4] sm:$0x3]  ;;  %v682_v61 = vld [vmem:[#allocation6 + $0x28] sm:$0xff]   ;;  %v683_v62 = vld [vmem:[#allocation6 + $0x30] sm:$0xff]  }
  0x44   :  { %191 = vmatpush1.bf16.msra.mxu0 %v647_v8  ;;  %580 = vmatpush3.bf16.msra.mxu1 %v666_v19  ;;  %v91_v45 = vrot.slane %v86_v43, %v90_v42  ;;  %v95_v46 = vrot.slane %v86_v43, %v94_v44  ;;  %v684_v63 = vld [vmem:[#allocation6 + $0x38] sm:$0xff]   ;;  %v549_v1 = vld [vmem:[%s870_s5] ss:$0 sm:$0xff] }
  0x45   :  { %192 = vmatprep.subr.bf16.mxu0 %v648_v9  ;;  %581 = vmatprep.subr.bf16.mxu1 %v667_v20  ;;  %v566_v12 = vld [vmem:[%s871_s6] ss:$0 sm:$0xff] }
  0x48   :  { %193 = vmatpush1.bf16.msra.mxu0 %v650_v11  ;;  %582 = vmatpush3.bf16.msra.mxu1 %v668_v23 }
  0x49   :  { %194 = vmatprep.subr.bf16.mxu0 %v651_v13  ;;  %583 = vmatprep.subr.bf16.mxu1 %v669_v24 }
  0x4c   :  { %195 = vmatpush1.bf16.msra.mxu0 %v653_v17  ;;  %584 = vmatpush3.bf16.msra.mxu1 %v670_v26 }
  0x4d   :  { %196 = vmatprep.subr.bf16.mxu0 %v654_v18  ;;  %585 = vmatprep.subr.bf16.mxu1 %v671_v27 }
  0x50   :  { %197 = vmatpush1.bf16.msra.mxu0 %v656_v21  ;;  %586 = vmatpush3.bf16.msra.mxu1 %v672_v29 }
  0x51   :  { %198 = vmatprep.subr.bf16.mxu0 %v657_v22  ;;  %587 = vmatprep.subr.bf16.mxu1 %v673_v30 }
  0x54   :  { %199 = vmatpush1.bf16.msra.mxu0 %v659_v25  ;;  %588 = vmatpush3.bf16.msra.mxu1 %v674_v31 }
  0x55   :  { %589 = vmatprep.subr.bf16.mxu1 %v675_v32  ;;  %606 = vmatprep.subr.bf16.mxu0 %v763_v35 }
  0x57   :  { %217 = vmatmul.mubr.bf16.vlgmr.msra.gmra.mrb[0].mxu0 %v660_v28 }
  0x58   :  { %590 = vmatpush3.bf16.msra.mxu1 %v676_v33  ;;  %607 = vmatpush3.bf16.msra.mxu0 %v677_v34 }
  0x59   :  { %608 = vmatprep.subr.bf16.mxu0 %v763_v35  ;;  %622 = vmatprep.mubr.msk.bf16.mxu0 %vm764_vm0, %v763_v35 }
  0x5c   :  { %609 = vmatpush3.bf16.msra.mxu0 %v678_v36 }
  0x5d   :  { %610 = vmatprep.subr.bf16.mxu0 %v763_v35 }
  0x60   :  { %611 = vmatpush3.bf16.msra.mxu0 %v679_v37 }
  0x61   :  { %612 = vmatprep.subr.bf16.mxu0 %v763_v35 }
  0x64   :  { %613 = vmatpush3.bf16.msra.mxu0 %v680_v38 }
  0x65   :  { %614 = vmatprep.subr.bf16.mxu0 %v763_v35 }
  0x68   :  { %615 = vmatpush3.bf16.msra.mxu0 %v681_v39 }
  0x69   :  { %616 = vmatprep.subr.bf16.mxu0 %v763_v35 }
  0x6c   :  { %617 = vmatpush3.bf16.msra.mxu0 %v682_v61 }
  0x6d   :  { %618 = vmatprep.subr.bf16.mxu0 %v763_v35 }
  0x70   :  { %619 = vmatpush3.bf16.msra.mxu0 %v683_v62 }
  0x71   :  { %620 = vmatprep.subr.bf16.mxu0 %v763_v35 }
  0x74   :  { %621 = vmatpush3.bf16.msra.mxu0 %v684_v63 }
 0x12a   :  { %v218_v47 = vpop.f32.mrb[0].mxu0 }
 0x12b   :  { %v219_v48 = vadd.f32 %v218_v47, %v91_v45  ;;  %v220_v49 = vpop.f32.mrb[1].mxu0 }
 0x12c   :  { %v221_v50 = vadd.f32 %v220_v49, %v95_v46  ;;  %v222_v51 = vpop.f32.mrb[2].mxu0 }
 0x12d   :  { %v223_v52 = vadd.f32 %v222_v51, %v91_v45  ;;  %v224_v53 = vpop.f32.mrb[3].mxu0  ;;  %v227_v55 = vmax.f32 %v219_v48, 0.0 }
 0x12e   :  { %v225_v54 = vadd.f32 %v224_v53, %v95_v46  ;;  %v228_v57 = vmax.f32 %v221_v50, 0.0 }
 0x12f   :  { %v229_v56 = vmax.f32 %v223_v52, 0.0 }
 0x130   :  { %v230_v58 = vmax.f32 %v225_v54, 0.0 }
 0x131   :  { %v231_v59 = vpack.c.bf16 %v229_v56, %v227_v55 }
 0x132   :  { %v232_v60 = vpack.c.bf16 %v230_v58, %v228_v57 }
 0x134   :  { %400 = vmatprep.mubr.bf16.mxu1 %v232_v60 }
 0x135   :  { %401 = vmatmul.mubr.bf16.vlgmr.msra.gmra.mrb[0].mxu1 %v231_v59 }
 0x208   :  { %v591_v0 = vpop.f32.mrb[0].mxu1 }
 0x209   :  { %v592_v2 = vpop.f32.mrb[1].mxu1 }
 0x20a   :  { %v593_v3 = vadd.f32 %v592_v2, %v591_v0  ;;  %v594_v4 = vpop.f32.mrb[2].mxu1 }
 0x20b   :  { %v595_v5 = vpop.f32.mrb[3].mxu1 }
 0x20c   :  { %v403_v6 = vadd.f32 %v593_v3, %v549_v1  ;;  %v596_v7 = vadd.f32 %v595_v5, %v594_v4 }
 0x20e   :  { %v406_v8 = vadd.f32 %v596_v7, %v549_v1  ;;  %v409_v9 = vmax.f32 %v403_v6, 0.0 }
 0x210   :  { %v410_v10 = vmax.f32 %v406_v8, 0.0 }
 0x212   :  { %v411_v11 = vpack.c.bf16 %v410_v10, %v409_v9 }
 0x214   :  { %623 = vmatmul.mubr.bf16.vlgmr.msra.gmra.mrb[4].mxu0 %v411_v11 }
 0x2e7   :  { %v517_v13 = vpop.f32.mrb[4].mxu0 }
 0x2e8   :  { %v518_v14 = vadd.f32 %v566_v12, %v517_v13  ;;  %v624_v15 = vpop.f32.mrb[5].mxu0 }
 0x2e9   :  { %v520_v16 = vpop.f32.mrb[6].mxu0 }
 0x2ea   :  { %524 = vst [vmem:[%s872_s7] sm:$0xff] %v518_v14  ;;  %v521_v17 = vadd.f32 %v566_v12, %v520_v16  ;;  %v625_v18 = vpop.f32.mrb[7].mxu0 }
 0x2ec   :  { %525 = vst [vmem:[%s872_s7 + $0x8] sm:$0xff] %v521_v17 }
 0x2ed   :  { %530 = vsyncpa [#allocation3], 1 }
 0x2ee   :  { %531 = vsyncpa [#allocation5], 1 }

</bundles_post_ra>
